<compile_context>
chip_gen: v5e
topology: v5e:2x2
jax: 0.10.0
libtpu: 0.0.40
codegen_flags: <defaults>
</compile_context>

<pallas_src>
import functools

import jax
import jax.numpy as jnp
from jax import lax
from jax.experimental import pallas as pl
from jax.experimental.pallas import tpu as pltpu

_LANE = 128
# 2048 rows * 128 lanes * 4 B = 1 MiB per f32 input block; 2 inputs x 2 pipeline
# buffers + accumulator ~= 5 MiB -> fits default scoped VMEM on all generations
# (incl. v7x's 64 MiB physical / 32 MiB default) while amortizing per-step cost.
_MAX_BLOCK_ROWS = 2048


def _mse_kernel(gen_ref, con_ref, out_ref, acc_ref, *, scale, rows_valid,
                block_rows, need_mask):
    """Accumulate (gen-con)^2 into a VMEM vector accumulator; reduce once.

    gen_ref, con_ref: (block_rows, 128) tiles in VMEM (any float dtype)
    out_ref:          (1, 1) f32 in SMEM (final scalar loss)
    acc_ref:          (block_rows, 128) f32 VMEM scratch, persists across steps
    """
    i = pl.program_id(0)

    @pl.when(i == 0)
    def _():
        acc_ref[...] = jnp.zeros_like(acc_ref)

    # Upcast inside the kernel (inputs may arrive as bf16) -> halves HBM traffic
    # versus casting in the wrapper.
    d = gen_ref[...].astype(jnp.float32) - con_ref[...].astype(jnp.float32)
    sq = d * d

    if need_mask:
        # The last grid step may read past the true row count (Pallas pads
        # partial boundary blocks with unspecified data) -> zero those rows.
        row_ids = i * block_rows + lax.broadcasted_iota(jnp.int32, sq.shape, 0)
        sq = jnp.where(row_ids < rows_valid, sq, jnp.float32(0.0))

    # Vector accumulate on the VPU only; no per-step cross-lane reduce.
    acc_ref[...] += sq

    @pl.when(i == pl.num_programs(0) - 1)
    def _():
        # Single XLU reduction + alpha/N scaling at the very end.
        out_ref[0, 0] = jnp.sum(acc_ref[...]) * jnp.float32(scale)


def content_loss(gen: jax.Array, con: jax.Array, alpha: float) -> jax.Array:
    """alpha * MSE(gen, con) with 'mean' reduction over all elements."""
    assert gen.shape == con.shape, "gen/con must have identical shapes"
    n_true = gen.size

    g = gen.reshape(-1)
    c = con.reshape(-1)

    # Only pad the (tiny) lane remainder when size is not a multiple of 128.
    # Padded zeros contribute 0 to the sum; the divisor is the TRUE count.
    lane_pad = (-n_true) % _LANE
    if lane_pad:
        g = jnp.pad(g, (0, lane_pad))
        c = jnp.pad(c, (0, lane_pad))

    rows = (n_true + lane_pad) // _LANE
    g2 = g.reshape(rows, _LANE)
    c2 = c.reshape(rows, _LANE)

    # Whole array as a single block when it fits; otherwise large fixed blocks.
    block_rows = rows if rows <= _MAX_BLOCK_ROWS else _MAX_BLOCK_ROWS
    grid_steps = pl.cdiv(rows, block_rows)
    need_mask = (rows % block_rows) != 0

    kernel = functools.partial(
        _mse_kernel,
        scale=float(alpha) / float(n_true),
        rows_valid=rows,
        block_rows=block_rows,
        need_mask=need_mask,
    )

    out = pl.pallas_call(
        kernel,
        out_shape=jax.ShapeDtypeStruct((1, 1), jnp.float32),
        grid_spec=pltpu.PrefetchScalarGridSpec(
            num_scalar_prefetch=0,
            grid=(grid_steps,),
            in_specs=[
                pl.BlockSpec((block_rows, _LANE), lambda i: (i, 0)),
                pl.BlockSpec((block_rows, _LANE), lambda i: (i, 0)),
            ],
            out_specs=pl.BlockSpec(memory_space=pltpu.SMEM),
            scratch_shapes=[pltpu.VMEM((block_rows, _LANE), jnp.float32)],
        ),
        compiler_params=pltpu.CompilerParams(
            dimension_semantics=("arbitrary",),  # serial reduction axis
        ),
    )(g2, c2)

    return out[0, 0]


if __name__ == "__main__":
    alpha = 0.7  # deterministic "parameter" from __init__

    key = jax.random.PRNGKey(0)
    k_gen, k_con = jax.random.split(key)
    # NCHW like the PyTorch conv-feature inputs
    gen = jax.random.normal(k_gen, (2, 4, 16, 16), dtype=jnp.float32)
    con = jax.random.normal(k_con, (2, 4, 16, 16), dtype=jnp.float32)

    loss = content_loss(gen, con, alpha)
    jax.block_until_ready(loss)

    # sanity check against pure-JAX reference
    ref = alpha * jnp.mean((gen - con) ** 2)
    assert jnp.allclose(loss, ref, rtol=1e-5, atol=1e-6), (loss, ref)

    print("KERNEL_OK")
</pallas_src>

<mosaic_0001>
module attributes {stable_mosaic.version = 11 : i64} {
  func.func @_mse_kernel(%arg0: i32, %arg1: memref<16x128xf32, #tpu.memory_space<vmem>>, %arg2: memref<16x128xf32, #tpu.memory_space<vmem>>, %arg3: memref<1x1xf32, #tpu.memory_space<smem>>, %arg4: memref<16x128xf32, #tpu.memory_space<vmem>>) attributes {dimension_semantics = [#tpu.dimension_semantics<arbitrary>], iteration_bounds = array<i64: 1>, scalar_prefetch = 0 : i64, scratch_operands = 1 : i64, tpu.core_type = #tpu.core_type<tc>, window_params = [{transform_indices = @transform_0, window_bounds = array<i64: 16, 128>}, {transform_indices = @transform_1, window_bounds = array<i64: 16, 128>}, {transform_indices = @transform_2, window_bounds = array<i64: 1, 1>}]} {
    %c0_i32 = arith.constant 0 : i32
    %0 = arith.cmpi eq, %arg0, %c0_i32 : i32
    %1 = arith.extui %0 : i1 to i32
    %c0_i32_0 = arith.constant 0 : i32
    %2 = arith.cmpi ne, %1, %c0_i32_0 : i32
    scf.if %2 {
      %cst = arith.constant 0.000000e+00 : f32
      %13 = vector.broadcast %cst : f32 to vector<16x128xf32>
      %c0_10 = arith.constant 0 : index
      %c0_11 = arith.constant 0 : index
      %14 = vector.load %arg4[%c0_10, %c0_11] : memref<16x128xf32, #tpu.memory_space<vmem>>, vector<16x128xf32>
      tpu.vector_store %arg4[%c0_10, %c0_11], %13 {strides = array<i32>} : memref<16x128xf32, #tpu.memory_space<vmem>>, vector<16x128xf32>,
    } else {
    }
    %c0 = arith.constant 0 : index
    %c0_1 = arith.constant 0 : index
    %3 = vector.load %arg1[%c0, %c0_1] : memref<16x128xf32, #tpu.memory_space<vmem>>, vector<16x128xf32>
    %c0_2 = arith.constant 0 : index
    %c0_3 = arith.constant 0 : index
    %4 = vector.load %arg2[%c0_2, %c0_3] : memref<16x128xf32, #tpu.memory_space<vmem>>, vector<16x128xf32>
    %5 = arith.subf %3, %4 : vector<16x128xf32>
    %6 = arith.mulf %5, %5 : vector<16x128xf32>
    %c0_4 = arith.constant 0 : index
    %c0_5 = arith.constant 0 : index
    %7 = vector.load %arg4[%c0_4, %c0_5] : memref<16x128xf32, #tpu.memory_space<vmem>>, vector<16x128xf32>
    %8 = arith.addf %7, %6 : vector<16x128xf32>
    %c0_6 = arith.constant 0 : index
    %c0_7 = arith.constant 0 : index
    %9 = vector.load %arg4[%c0_6, %c0_7] : memref<16x128xf32, #tpu.memory_space<vmem>>, vector<16x128xf32>
    tpu.vector_store %arg4[%c0_6, %c0_7], %8 {strides = array<i32>} : memref<16x128xf32, #tpu.memory_space<vmem>>, vector<16x128xf32>,
    %c0_i32_8 = arith.constant 0 : i32
    %10 = arith.cmpi eq, %arg0, %c0_i32_8 : i32
    %11 = arith.extui %10 : i1 to i32
    %c0_i32_9 = arith.constant 0 : i32
    %12 = arith.cmpi ne, %11, %c0_i32_9 : i32
    scf.if %12 {
      %c0_10 = arith.constant 0 : index
      %c0_11 = arith.constant 0 : index
      %13 = vector.load %arg4[%c0_10, %c0_11] : memref<16x128xf32, #tpu.memory_space<vmem>>, vector<16x128xf32>
      %14 = vector.shape_cast %13 : vector<16x128xf32> to vector<1x16x128xf32>
      %cst = arith.constant dense<0.000000e+00> : vector<1xf32>
      %15 = vector.multi_reduction <add>, %14, %cst [1, 2] : vector<1x16x128xf32> to vector<1xf32>
      %16 = vector.shape_cast %15 : vector<1xf32> to vector<1x1x1xf32>
      %17 = vector.extract %16[0, 0, 0] : f32 from vector<1x1x1xf32>
      %cst_12 = arith.constant 3.41796869E-4 : f32
      %18 = arith.mulf %17, %cst_12 : f32
      %c0_13 = arith.constant 0 : index
      %c0_14 = arith.constant 0 : index
      %19 = memref.load %arg3[%c0_13, %c0_14] : memref<1x1xf32, #tpu.memory_space<smem>>
      memref.store %18, %arg3[%c0_13, %c0_14] : memref<1x1xf32, #tpu.memory_space<smem>>
    } else {
    }
    return
  }
  func.func @transform_0(%arg0: i32) -> (i32, i32) {
    %c0_i32 = arith.constant 0 : i32
    %c0_i32_0 = arith.constant 0 : i32
    return %arg0, %c0_i32 : i32, i32
  }
  func.func @transform_1(%arg0: i32) -> (i32, i32) {
    %c0_i32 = arith.constant 0 : i32
    %c0_i32_0 = arith.constant 0 : i32
    return %arg0, %c0_i32 : i32, i32
  }
  func.func @transform_2(%arg0: i32) -> (i32, i32) {
    %c0_i32 = arith.constant 0 : i32
    %c0_i32_0 = arith.constant 0 : i32
    %c0_i32_1 = arith.constant 0 : i32
    return %c0_i32, %c0_i32_0 : i32, i32
  }
}

</mosaic_0001>

<bundles_post_ra>
// kernel: tpu_custom_call.1
= control target key start
LH: loop header
LB: loop body
LE: loop exit
PB: predicated region body
PF: predicated region fallthrough
CT: control target
= control target key end

     0   :  { %7 = vsyncpa [#allocation4], 0  ;;  %s201_s0 = inlined_call_operand.hbm [shape: f32[16,128], index: 0, kind: input, shape index: {}]   ;;  %s202_s1 = inlined_call_operand.hbm [shape: f32[16,128], index: 1, kind: input, shape index: {}]   ;;  %s203_s2 = inlined_call_operand.hbm [shape: f32[1,1], index: 2, kind: output, shape index: {}]  }
   0x1   :  { %8 = vsyncpa [#allocation7], 0 }
   0x2   :  { %9 = vsyncpa [#allocation5], 0  ;;  %s14_s11 = sshll.u32 %s201_s0, 4  ;;  %s172_s12 = smov [#allocation3]   ;;  %s15_s11 = int_to_ptr.hbm [resolvable:$true] %s14_s11 }
   0x3   :  { %s16_s13 = sshll.u32 %s172_s12, 4  ;;  %s27_s16 = sshll.u32 %s202_s1, 4  ;;  %s17_s13 = int_to_ptr.vmem [resolvable:$true] %s16_s13  ;;  %s28_s16 = int_to_ptr.hbm [resolvable:$true] %s27_s16 }
   0x4   :  { %s173_s17 = smov 128   ;;  %s174_s18 = smov 8  }
   0x5   :  { %22 = dma.hbm_to_vmem [thread:$0]  %s15_s11, 256, %s17_s13, [#allocation4], %s173_s17, %s173_s17, %s174_s18  }
   0x6   :  { %s175_s19 = smov [#allocation6]  }
   0x7   :  { %s29_s20 = sshll.u32 %s175_s19, 4  ;;  %s30_s20 = int_to_ptr.vmem [resolvable:$true] %s29_s20 }
   0x8   :  { %35 = dma.hbm_to_vmem [thread:$0]  %s28_s16, 256, %s30_s20, [#allocation7], %s173_s17, %s173_s17, %s174_s18  }
   0x9   :  { %166 = dma.done.wait [#allocation4], 256  }
   0xa   :  { %167 = vsyncadd [#allocation4], 4294967040 }
   0xb   :  { %168 = dma.done.wait [#allocation7], 256  }
   0xc   :  { %169 = vsyncadd [#allocation7], 4294967040  ;;  %v50_v0 = vld [vmem:[#allocation3] sm:$0xff]  ;;  %v51_v1 = vld [vmem:[#allocation3 + $0x8] sm:$0xff]  ;;  %s87_s21 = sshll.u32 %s203_s2, 4  ;;  %s176_s24 = smov [#allocation8]   ;;  %s88_s21 = int_to_ptr.hbm [resolvable:$true] %s87_s21 }
   0xd   :  { %v52_v2 = vld [vmem:[#allocation6] sm:$0xff]  ;;  %v53_v3 = vld [vmem:[#allocation6 + $0x8] sm:$0xff] }
   0xe   :  { %v54_v4 = vsub.f32 %v50_v0, %v52_v2  ;;  %v55_v5 = vsub.f32 %v51_v1, %v53_v3 }
  0x10   :  { %v56_v6 = vmul.f32 %v54_v4, %v54_v4  ;;  %v57_v7 = vmul.f32 %v55_v5, %v55_v5 }
  0x12   :  { %v69_v8 = vadd.f32 %v57_v7, %v56_v6 }
  0x14   :  { %70 = vadd.xlane.f32.xlu0 %v69_v8 }
  0x87   :  { %v71_v9 = vpop.xlane.xlu0 %70 }
  0x88   :  { %v72_v10 = vrot.slane %v71_v9, 4 }
  0x8a   :  { %v73_v11 = vadd.f32 %v72_v10, %v71_v9 }
  0x8c   :  { %v74_v12 = vrot.slane %v73_v11, 2 }
  0x8e   :  { %v75_v13 = vadd.f32 %v74_v12, %v73_v11 }
  0x90   :  { %v76_v14 = vrot.slane %v75_v13, 1 }
  0x92   :  { %v77_v15 = vadd.f32 %v76_v14, %v75_v13 }
  0x94   :  { %99 = vpush %v77_v15 }
  0xc5   :  { %s100_s22 = spop %99 }
  0xc6   :  { %s79_s23 = smul.f32 0.00034179687, %s100_s22 }
  0xc8   :  { %81 = sst [smem:[#allocation8]] %s79_s23 }
  0xc9   :  { %90 = dma.smem_to_hbm %s176_s24, 16, %s88_s21, [#allocation5]  }
  0xca   :  { %170 = dma.done.wait [#allocation5], 16  }
  0xcb   :  { %171 = vsyncadd [#allocation5], 4294967280 }
  0xcc   :  { %95 = sfence }
  0xcd   :  { %96 = vsyncpa [#allocation4], 1 }
  0xce   :  { %97 = vsyncpa [#allocation7], 1 }
  0xcf   :  { %98 = vsyncpa [#allocation5], 1 }

</bundles_post_ra>
